<compile_context>
chip_gen: v5e
topology: v5e:2x2
jax: 0.10.0
libtpu: 0.0.40
codegen_flags: <defaults>
</compile_context>

<pallas_src>
import numpy as np

import jax
import jax.numpy as jnp
from jax.experimental import pallas as pl
from jax.experimental.pallas import tpu as pltpu


def _copy_kernel(x_ref, o_ref):
    # Pure passthrough of the current block.
    o_ref[...] = x_ref[...]


# Minimum sublane tile per dtype byte-width (f32: 8, bf16: 16, int8/fp8: 32).
_SUBLANE_MIN = {4: 8, 2: 16, 1: 32}


def _vmem_budget():
    """Pick (target_block_bytes, vmem_limit_bytes) per TPU generation."""
    try:
        info = pltpu.get_tpu_info()
        vmem = int(getattr(info, "vmem_capacity_bytes"))
    except Exception:
        vmem = None
    if vmem is not None and vmem <= 64 * 1024 * 1024:
        # v7x: 64 MiB physical VMEM per TC.
        # 8 MiB block * 2 specs * 2 buffers = 32 MiB, headroom under 48 MiB.
        return 8 * 1024 * 1024, 48 * 1024 * 1024
    if vmem is not None:
        # v5e / v6e: 128 MiB physical VMEM.  8 MiB * 4 buffers = 32 MiB.
        return 8 * 1024 * 1024, 64 * 1024 * 1024
    # Unknown chip: conservative defaults (fits every generation's budget).
    return 4 * 1024 * 1024, 32 * 1024 * 1024


def _pick_lane_width(n_elems):
    """Largest lane width (multiple of 128) that divides the element count."""
    for lane in (8192, 4096, 2048, 1024, 512, 256, 128):
        if n_elems % lane == 0:
            return lane
    return None


def _cdiv(a, b):
    return -(-a // b)


def _align_down(v, m):
    return max((v // m) * m, m)


def _row_tiling(rows, lane_elems, itemsize, target_block_bytes, sublane_min):
    """Pick a sublane-aligned row tile and a (best-effort even) grid size."""
    row_tile = max(target_block_bytes // max(lane_elems * itemsize, 1), sublane_min)
    row_tile = _align_down(row_tile, sublane_min)
    if row_tile >= rows:
        # Whole array in one block (block dim == full dim is always legal).
        return rows, 1
    grid_n = _cdiv(rows, row_tile)
    if grid_n > 1 and grid_n % 2 == 1:
        # Best-effort: aim for an even number of steps so v7x's 2 TensorCores
        # split the "parallel" axis evenly (no effect on 1-TC v5e/v6e).
        new_tile = _align_down(_cdiv(rows, grid_n + 1), sublane_min)
        if sublane_min <= new_tile < row_tile:
            row_tile = new_tile
            grid_n = _cdiv(rows, row_tile)
    return row_tile, grid_n


def _pallas_copy(x2, rows, lane, row_tile, grid_n, nbytes, vmem_limit, donate):
    compiler_params = pltpu.CompilerParams(
        dimension_semantics=("parallel",),
        vmem_limit_bytes=vmem_limit,
    )
    cost = pl.CostEstimate(flops=0, transcendentals=0, bytes_accessed=2 * nbytes)
    return pl.pallas_call(
        _copy_kernel,
        out_shape=jax.ShapeDtypeStruct((rows, lane), x2.dtype),
        grid_spec=pltpu.PrefetchScalarGridSpec(
            num_scalar_prefetch=0,
            grid=(grid_n,),
            in_specs=[pl.BlockSpec((row_tile, lane), lambda i: (i, 0))],
            out_specs=pl.BlockSpec((row_tile, lane), lambda i: (i, 0)),
        ),
        compiler_params=compiler_params,
        cost_estimate=cost,
        input_output_aliases={0: 0} if donate else {},
    )(x2)


def dummy_transformer_block(x, *, force_kernel=False, donate=False):
    """Identity forward of DummyTransformerBlock.

    Args:
      x: jnp.ndarray of any shape/dtype (GPT activations (B, T, D) typically).
      force_kernel: if False (default), short-circuit the identity and return
        x directly — zero HBM traffic, matching the module's `return x`.
        If True, route through a streaming Pallas copy kernel.
      donate: kernel path only — alias the input buffer to the output (the
        caller must not read the input afterwards).

    Returns:
      jnp.ndarray equal to x (same shape, same dtype).
    """
    if not force_kernel:
        # Fastest correct implementation of `forward(x): return x`.
        return x

    orig_shape = x.shape
    dtype = x.dtype
    itemsize = jnp.dtype(dtype).itemsize
    n_elems = int(np.prod(orig_shape)) if orig_shape else 1
    nbytes = n_elems * itemsize

    # Degenerate inputs: nothing to stream.
    if n_elems == 0 or x.ndim == 0:
        return x

    target_block_bytes, vmem_limit = _vmem_budget()
    sublane_min = _SUBLANE_MIN.get(itemsize, 8)

    lane = _pick_lane_width(n_elems)
    if lane is not None:
        # Lane-dense 2-D view: last dim is a large multiple of 128 (unmasked
        # vst, fat DMA descriptors).  For contiguous activations this reshape
        # is a bitcast, so donation propagates.
        rows = n_elems // lane
    else:
        # Element count not a multiple of 128: keep the ORIGINAL last dim as
        # the lane dim (block last dim == full array dim is always legal) and
        # tile the flattened leading rows — streaming + pipelining preserved,
        # no single-whole-array block that could exceed VMEM.
        lane = orig_shape[-1] if x.ndim >= 1 else 1
        rows = n_elems // lane

    x2 = x.reshape(rows, lane)
    row_tile, grid_n = _row_tiling(rows, lane, itemsize,
                                   target_block_bytes, sublane_min)

    out2 = _pallas_copy(x2, rows, lane, row_tile, grid_n, nbytes,
                        vmem_limit, donate)
    return out2.reshape(orig_shape)


if __name__ == "__main__":
    # DummyTransformerBlock has no parameters, so only input activations exist.
    key = jax.random.PRNGKey(0)
    B, T, D = 2, 8, 32  # batch=2, seq=8, hidden=32
    x = jax.random.normal(key, (B, T, D), dtype=jnp.float32)
    expected = np.asarray(x)

    # 1) Default path: identity short-circuit (the module's actual semantics).
    y_fast = jax.block_until_ready(dummy_transformer_block(x))
    assert y_fast.shape == expected.shape and y_fast.dtype == expected.dtype
    assert np.array_equal(np.asarray(y_fast), expected)

    # 2) Forced Pallas copy kernel: lane-dense path (n_elems % 128 == 0).
    y_kernel = jax.block_until_ready(dummy_transformer_block(x, force_kernel=True))
    assert y_kernel.shape == expected.shape and y_kernel.dtype == expected.dtype
    assert np.array_equal(np.asarray(y_kernel), expected)

    # 3) Forced Pallas copy kernel: fallback path (last dim not 128-divisible).
    x_odd = jax.random.normal(key, (2, 8, 30), dtype=jnp.float32)
    expected_odd = np.asarray(x_odd)
    y_odd = jax.block_until_ready(dummy_transformer_block(x_odd, force_kernel=True))
    assert y_odd.shape == expected_odd.shape and y_odd.dtype == expected_odd.dtype
    assert np.array_equal(np.asarray(y_odd), expected_odd)

    print("KERNEL_OK")
</pallas_src>

<mosaic_0001>
module attributes {stable_mosaic.version = 11 : i64} {
  func.func @_copy_kernel(%arg0: i32, %arg1: memref<1x512xf32, #tpu.memory_space<vmem>>, %arg2: memref<1x512xf32, #tpu.memory_space<vmem>>) attributes {dimension_semantics = [#tpu.dimension_semantics<parallel>], iteration_bounds = array<i64: 1>, scalar_prefetch = 0 : i64, scratch_operands = 0 : i64, tpu.core_type = #tpu.core_type<tc>, window_params = [{transform_indices = @transform_0, window_bounds = array<i64: 1, 512>}, {transform_indices = @transform_1, window_bounds = array<i64: 1, 512>}]} {
    %c0 = arith.constant 0 : index
    %c0_0 = arith.constant 0 : index
    %0 = vector.load %arg1[%c0, %c0_0] : memref<1x512xf32, #tpu.memory_space<vmem>>, vector<1x512xf32>
    %c0_1 = arith.constant 0 : index
    %c0_2 = arith.constant 0 : index
    %1 = vector.load %arg2[%c0_1, %c0_2] : memref<1x512xf32, #tpu.memory_space<vmem>>, vector<1x512xf32>
    tpu.vector_store %arg2[%c0_1, %c0_2], %0 {strides = array<i32>} : memref<1x512xf32, #tpu.memory_space<vmem>>, vector<1x512xf32>,
    return
  }
  func.func @transform_0(%arg0: i32) -> (i32, i32) {
    %c0_i32 = arith.constant 0 : i32
    %c0_i32_0 = arith.constant 0 : i32
    return %arg0, %c0_i32 : i32, i32
  }
  func.func @transform_1(%arg0: i32) -> (i32, i32) {
    %c0_i32 = arith.constant 0 : i32
    %c0_i32_0 = arith.constant 0 : i32
    return %arg0, %c0_i32 : i32, i32
  }
}

</mosaic_0001>

<bundles_post_ra>
// kernel: tpu_custom_call.1
= control target key start
LH: loop header
LB: loop body
LE: loop exit
PB: predicated region body
PF: predicated region fallthrough
CT: control target
= control target key end

     0   :  { %6 = vsyncpa [#allocation3], 0  ;;  %s118_s0 = inlined_call_operand.hbm [shape: f32[1,512], index: 0, kind: input, shape index: {}]   ;;  %s119_s1 = inlined_call_operand.hbm [shape: f32[1,512], index: 1, kind: output, shape index: {}]  }
   0x1   :  { %7 = vsyncpa [#allocation4], 0  ;;  %s13_s8 = sshll.u32 %s118_s0, 4  ;;  %s100_s9 = smov [#allocation2]   ;;  %s14_s8 = int_to_ptr.hbm [resolvable:$true] %s13_s8 }
   0x2   :  { %s15_s10 = sshll.u32 %s100_s9, 4  ;;  %s16_s10 = int_to_ptr.vmem [resolvable:$true] %s15_s10 }
   0x3   :  { %18 = dma.hbm_to_vmem [thread:$0]  %s14_s8, 64, %s16_s10, [#allocation3]  }
   0x4   :  { %96 = dma.done.wait [#allocation3], 64  }
   0x5   :  { %97 = vsyncadd [#allocation3], 4294967232  ;;  %v24_v0 = vlaneseq  ;;  %s101_s11 = smov [#allocation5]   ;;  %s36_s15 = sshll.u32 %s119_s1, 4  ;;  %v23_v1 = vld [vmem:[#allocation2] sm:$0xf]  ;;  %s37_s15 = int_to_ptr.hbm [resolvable:$true] %s36_s15 }
   0x6   :  { %s34_s12 = sshll.u32 %s101_s11, 4  ;;  %s35_s12 = int_to_ptr.vmem [resolvable:$true] %s34_s12 }
   0x7   :  { %vm26_vm0 = vcmp.lt.s32.totalorder %v24_v0, 512 }
   0x8   :  { %28 = vst.msk [vmem:[#allocation5] sm:$0xf] %vm26_vm0, %v23_v1 }
   0x9   :  { %39 = dma.vmem_to_hbm [thread:$0]  %s35_s12, 64, %s37_s15, [#allocation4]  }
   0xa   :  { %98 = dma.done.wait [#allocation4], 64  }
   0xb   :  { %99 = vsyncadd [#allocation4], 4294967232 }
   0xc   :  { %44 = vsyncpa [#allocation3], 1 }
   0xd   :  { %45 = vsyncpa [#allocation4], 1 }

</bundles_post_ra>
